<compile_context>
chip_gen: v7x
topology: tpu7x:2x2x1
jax: 0.10.0
libtpu: 0.0.40
codegen_flags: <defaults>
</compile_context>

<pallas_src>
import math
import numpy as np
import jax
import jax.numpy as jnp
from jax.experimental import pallas as pl
from jax.experimental.pallas import tpu as pltpu

# ----- module hyper-parameters (degree=5, continuity_order=2 as in __init__ defaults) -----
DEGREE = 5
CONT = 2
K = DEGREE + 1            # polynomial coefficients per segment
N_KNOTS = 9
NSEG = N_KNOTS - 1
KN = K * NSEG             # 48 useful contraction lanes
KN_PAD = 128              # contraction padded to full lane width (zero rows in pmat)
DIM = 3
DIM_PAD = 128             # lane-padded feature dim for dense (unmasked) stores
BATCH = 256               # total queries per pallas_call
TB = 128                  # batch tile per grid step (v5e MXU granularity; 2 tiles = 256 for v6e/v7x)


def hermite_kernel(x_ref, params_ref, pmat_ref, out_ref):
    x = x_ref[...]                                   # (TB, 1)
    p = params_ref[...]                              # (8, 128)
    tl = p[0:1, :]                                   # (1, 128) left interval bound per lane
    tr = p[1:2, :]                                   # (1, 128) right interval bound per lane
    tleft = p[2:3, :]                                # (1, 128) t[s] on k==0 lanes, else 0
    krow = p[3:4, :]                                 # (1, 128) float(k) per lane, -1 on pad

    # segment one-hot, replicated across the K poly lanes:
    # lane (k*NSEG + s) active iff t[s] <= x < t[s+1] (clipping baked via +-1e30 sentinels)
    onehot = jnp.logical_and(x >= tl, x < tr).astype(jnp.float32)    # (TB, 128)

    # left knot of the selected segment (only the k==0 lanes carry t[s])
    ti = jnp.sum(onehot * tleft, axis=1, keepdims=True)              # (TB, 1)
    f = x - ti                                                        # (TB, 1)

    # fpow lane (k*NSEG + s) = f**k, built incrementally (no integer_pow, no iota/div)
    fpow = jnp.zeros((TB, KN_PAD), jnp.float32)
    fk = jnp.ones_like(f)
    for k in range(K):
        fpow = jnp.where(krow == float(k), fk, fpow)
        fk = fk * f
    W = onehot * fpow                                                 # (TB, 128)

    # fused gather + polynomial contraction: single (TB,128)@(128,128) MXU matmul
    out_ref[...] = jnp.dot(W, pmat_ref[...], preferred_element_type=jnp.float32)


def hermite_spline_forward(x_in, params_in, pmat_in):
    out = pl.pallas_call(
        hermite_kernel,
        out_shape=jax.ShapeDtypeStruct((BATCH, DIM_PAD), jnp.float32),
        grid=(BATCH // TB,),
        in_specs=[
            pl.BlockSpec((TB, 1), lambda b: (b, 0)),
            pl.BlockSpec((8, 128), lambda b: (0, 0)),
            pl.BlockSpec((KN_PAD, DIM_PAD), lambda b: (0, 0)),
        ],
        out_specs=pl.BlockSpec((TB, DIM_PAD), lambda b: (b, 0)),
        compiler_params=pltpu.CompilerParams(dimension_semantics=("parallel",)),
    )(x_in, params_in, pmat_in)
    return out[:, :DIM]


def build_hmat(t_np, degree, cont):
    """Host-side (float64) construction of the Hermite basis matrix, as in __init__."""
    kk = degree + 1
    dt = (t_np[1:] - t_np[:-1]).reshape(-1, 1, 1).astype(np.float64)
    cmat = np.zeros((kk, kk), np.float64)
    emat = np.zeros((kk, kk), np.float64)
    for d in range(cont + 1):
        cmat[d, d] = math.factorial(d)
    cs = np.ones(kk, np.float64)
    es = np.arange(kk, dtype=np.float64)
    for d in range(cont + 1):
        row = cont + 1 + d
        cmat[row] = cs
        emat[row] = es
        cs = cs * es
        es = np.concatenate([np.zeros(1), es])[:-1]
    for i in range(2 * (cont + 1), degree + 1):
        cmat[i, i] = 1.0
        emat[i, i] = i
    wmat = cmat[None] * dt ** emat[None]                 # (NSEG, K, K)
    wt = np.swapaxes(wmat, -1, -2)
    hmat = wt @ np.linalg.inv(wmat @ wt)
    return hmat


if __name__ == "__main__":
    key = jax.random.PRNGKey(0)
    k1, k2, k3 = jax.random.split(key, 3)

    # Constructor inputs / parameters (deterministic, synthetic)
    t_np = np.arange(N_KNOTS, dtype=np.float64) * 1.0          # strictly increasing knot times
    positions = np.asarray(jax.random.normal(k1, (N_KNOTS, DIM)), np.float64)
    diff_coeffs = 0.1 * np.asarray(jax.random.normal(k2, (CONT, N_KNOTS, DIM)), np.float64)
    n_add = DEGREE + 1 - 2 * (CONT + 1)
    additional_coeffs = np.zeros((n_add, NSEG, DIM), np.float64)
    # TODO(synk): the LBFGS minimum-integrated-energy (mie) initialisation of the
    # parameters in __init__ is a training-time optimisation with no kernel
    # equivalent; parameters are small deterministic values instead.

    hmat = build_hmat(t_np, DEGREE, CONT)                      # (NSEG, K, K) f64

    # coeff_matrix rows (torch vstack, before the final transpose): (K, NSEG, DIM)
    c_rows = np.concatenate(
        [
            positions[:-1][None],
            diff_coeffs[:, :-1],
            positions[1:][None],
            diff_coeffs[:, 1:],
            additional_coeffs,
        ],
        axis=0,
    )

    # Batch-independent precompute (outside the kernel):
    # p_mat[k, s, :] = sum_j hmat[s, k, j] * c_rows[j, s, :]; row (k*NSEG + s)
    # lines up with lane (k*NSEG + s) of the in-kernel W matrix.
    p_mat_ksd = np.einsum("skj,jsd->ksd", hmat, c_rows)
    pmat_pad = np.zeros((KN_PAD, DIM_PAD), np.float32)
    pmat_pad[:KN, :DIM] = p_mat_ksd.reshape(KN, DIM).astype(np.float32)
    # NOTE: lanes DIM..127 are free; additional splines / derivative orders sharing
    # the same knot vector could be packed side-by-side here at zero kernel cost.

    # Packed per-call constants (single (8,128) slab -> one DMA)
    params = np.zeros((8, 128), np.float32)
    tl_full = np.full((128,), 1e30, np.float32)        # pad lanes never selected
    tr_full = np.full((128,), 1e30, np.float32)
    tleft_full = np.zeros((128,), np.float32)
    krow_full = np.full((128,), -1.0, np.float32)      # pad lanes never match any k
    for k in range(K):
        for s in range(NSEG):
            lane = k * NSEG + s
            tl_full[lane] = -1e30 if s == 0 else float(t_np[s])          # clip below -> seg 0
            tr_full[lane] = 1e30 if s == NSEG - 1 else float(t_np[s + 1])  # clip above -> last seg
            krow_full[lane] = float(k)
            if k == 0:
                tleft_full[lane] = float(t_np[s])
    params[0] = tl_full
    params[1] = tr_full
    params[2] = tleft_full
    params[3] = krow_full

    # Forward queries: sorted, inside [t[0], t[-1]]
    x_np = np.sort(
        np.asarray(
            jax.random.uniform(k3, (BATCH,), jnp.float32,
                               minval=float(t_np[0]), maxval=float(t_np[-1]))
        )
    )

    # Pack kernel inputs
    x_in = jnp.asarray(x_np.reshape(BATCH, 1), jnp.float32)
    params_in = jnp.asarray(params)
    pmat_in = jnp.asarray(pmat_pad)

    p = hermite_spline_forward(x_in, params_in, pmat_in)
    p = jax.block_until_ready(p)

    # numpy reference mirroring the PyTorch forward (derivative_order=0)
    c_T = c_rows.transpose(1, 0, 2)                            # (NSEG, K, DIM)
    p_mat_ref = np.einsum("skj,sjd->skd", hmat, c_T)
    i = np.clip(np.searchsorted(t_np.astype(np.float32), x_np, side="right") - 1, 0, NSEG - 1)
    f = (x_np.astype(np.float64) - t_np[i])[:, None]
    t_pow = f ** np.arange(K, dtype=np.float64)[None, :]
    p_ref = np.einsum("nk,nkd->nd", t_pow, p_mat_ref[i])

    np.testing.assert_allclose(np.asarray(p), p_ref, rtol=2e-3, atol=2e-3)
    print("KERNEL_OK")
</pallas_src>

<mosaic_0001>
module attributes {stable_mosaic.version = 11 : i64} {
  func.func @hermite_kernel(%arg0: i32, %arg1: memref<128x1xf32, #tpu.memory_space<vmem>>, %arg2: memref<8x128xf32, #tpu.memory_space<vmem>>, %arg3: memref<128x128xf32, #tpu.memory_space<vmem>>, %arg4: memref<128x128xf32, #tpu.memory_space<vmem>>) attributes {dimension_semantics = [#tpu.dimension_semantics<parallel>], iteration_bounds = array<i64: 2>, scalar_prefetch = 0 : i64, scratch_operands = 0 : i64, tpu.core_type = #tpu.core_type<tc>, window_params = [{transform_indices = @transform_0, window_bounds = array<i64: 128, 1>}, {pipeline_mode = #tpu.pipeline_mode<synchronous>, transform_indices = @transform_1, window_bounds = array<i64: 8, 128>}, {pipeline_mode = #tpu.pipeline_mode<synchronous>, transform_indices = @transform_2, window_bounds = array<i64: 128, 128>}, {transform_indices = @transform_3, window_bounds = array<i64: 128, 128>}]} {
    %c0 = arith.constant 0 : index
    %c0_0 = arith.constant 0 : index
    %0 = vector.load %arg1[%c0, %c0_0] : memref<128x1xf32, #tpu.memory_space<vmem>>, vector<128x1xf32>
    %c0_1 = arith.constant 0 : index
    %c0_2 = arith.constant 0 : index
    %1 = vector.load %arg2[%c0_1, %c0_2] : memref<8x128xf32, #tpu.memory_space<vmem>>, vector<8x128xf32>
    %2 = vector.extract_strided_slice %1 {offsets = [0, 0], sizes = [1, 128], strides = [1, 1]} : vector<8x128xf32> to vector<1x128xf32>
    %3 = vector.extract_strided_slice %1 {offsets = [1, 0], sizes = [1, 128], strides = [1, 1]} : vector<8x128xf32> to vector<1x128xf32>
    %4 = vector.extract_strided_slice %1 {offsets = [2, 0], sizes = [1, 128], strides = [1, 1]} : vector<8x128xf32> to vector<1x128xf32>
    %5 = vector.extract_strided_slice %1 {offsets = [3, 0], sizes = [1, 128], strides = [1, 1]} : vector<8x128xf32> to vector<1x128xf32>
    %6 = vector.broadcast %0 : vector<128x1xf32> to vector<128x128xf32>
    %7 = vector.broadcast %2 : vector<1x128xf32> to vector<128x128xf32>
    %8 = arith.cmpf oge, %6, %7 : vector<128x128xf32>
    %9 = vector.broadcast %0 : vector<128x1xf32> to vector<128x128xf32>
    %10 = vector.broadcast %3 : vector<1x128xf32> to vector<128x128xf32>
    %11 = arith.cmpf olt, %9, %10 : vector<128x128xf32>
    %12 = arith.andi %8, %11 : vector<128x128xi1>
    %13 = arith.extui %12 : vector<128x128xi1> to vector<128x128xi32>
    %14 = arith.sitofp %13 : vector<128x128xi32> to vector<128x128xf32>
    %15 = vector.broadcast %4 : vector<1x128xf32> to vector<128x128xf32>
    %16 = arith.mulf %14, %15 : vector<128x128xf32>
    %cst = arith.constant dense<0.000000e+00> : vector<128xf32>
    %17 = vector.multi_reduction <add>, %16, %cst [1] : vector<128x128xf32> to vector<128xf32>
    %18 = vector.shape_cast %17 : vector<128xf32> to vector<128x1xf32>
    %19 = arith.subf %0, %18 : vector<128x1xf32>
    %cst_3 = arith.constant 0.000000e+00 : f32
    %20 = vector.broadcast %cst_3 : f32 to vector<128x128xf32>
    %cst_4 = arith.constant 1.000000e+00 : f32
    %21 = vector.broadcast %cst_4 : f32 to vector<128x1xf32>
    %cst_5 = arith.constant 0.000000e+00 : f32
    %22 = vector.broadcast %cst_5 : f32 to vector<1x128xf32>
    %23 = arith.cmpf oeq, %5, %22 : vector<1x128xf32>
    %24 = vector.shape_cast %23 : vector<1x128xi1> to vector<1x128xi1>
    %25 = vector.broadcast %24 : vector<1x128xi1> to vector<128x128xi1>
    %26 = vector.shape_cast %21 : vector<128x1xf32> to vector<128x1xf32>
    %27 = vector.broadcast %26 : vector<128x1xf32> to vector<128x128xf32>
    %28 = arith.select %25, %27, %20 : vector<128x128xi1>, vector<128x128xf32>
    %29 = arith.mulf %21, %19 : vector<128x1xf32>
    %cst_6 = arith.constant 1.000000e+00 : f32
    %30 = vector.broadcast %cst_6 : f32 to vector<1x128xf32>
    %31 = arith.cmpf oeq, %5, %30 : vector<1x128xf32>
    %32 = vector.shape_cast %31 : vector<1x128xi1> to vector<1x128xi1>
    %33 = vector.broadcast %32 : vector<1x128xi1> to vector<128x128xi1>
    %34 = vector.shape_cast %29 : vector<128x1xf32> to vector<128x1xf32>
    %35 = vector.broadcast %34 : vector<128x1xf32> to vector<128x128xf32>
    %36 = arith.select %33, %35, %28 : vector<128x128xi1>, vector<128x128xf32>
    %37 = arith.mulf %29, %19 : vector<128x1xf32>
    %cst_7 = arith.constant 2.000000e+00 : f32
    %38 = vector.broadcast %cst_7 : f32 to vector<1x128xf32>
    %39 = arith.cmpf oeq, %5, %38 : vector<1x128xf32>
    %40 = vector.shape_cast %39 : vector<1x128xi1> to vector<1x128xi1>
    %41 = vector.broadcast %40 : vector<1x128xi1> to vector<128x128xi1>
    %42 = vector.shape_cast %37 : vector<128x1xf32> to vector<128x1xf32>
    %43 = vector.broadcast %42 : vector<128x1xf32> to vector<128x128xf32>
    %44 = arith.select %41, %43, %36 : vector<128x128xi1>, vector<128x128xf32>
    %45 = arith.mulf %37, %19 : vector<128x1xf32>
    %cst_8 = arith.constant 3.000000e+00 : f32
    %46 = vector.broadcast %cst_8 : f32 to vector<1x128xf32>
    %47 = arith.cmpf oeq, %5, %46 : vector<1x128xf32>
    %48 = vector.shape_cast %47 : vector<1x128xi1> to vector<1x128xi1>
    %49 = vector.broadcast %48 : vector<1x128xi1> to vector<128x128xi1>
    %50 = vector.shape_cast %45 : vector<128x1xf32> to vector<128x1xf32>
    %51 = vector.broadcast %50 : vector<128x1xf32> to vector<128x128xf32>
    %52 = arith.select %49, %51, %44 : vector<128x128xi1>, vector<128x128xf32>
    %53 = arith.mulf %45, %19 : vector<128x1xf32>
    %cst_9 = arith.constant 4.000000e+00 : f32
    %54 = vector.broadcast %cst_9 : f32 to vector<1x128xf32>
    %55 = arith.cmpf oeq, %5, %54 : vector<1x128xf32>
    %56 = vector.shape_cast %55 : vector<1x128xi1> to vector<1x128xi1>
    %57 = vector.broadcast %56 : vector<1x128xi1> to vector<128x128xi1>
    %58 = vector.shape_cast %53 : vector<128x1xf32> to vector<128x1xf32>
    %59 = vector.broadcast %58 : vector<128x1xf32> to vector<128x128xf32>
    %60 = arith.select %57, %59, %52 : vector<128x128xi1>, vector<128x128xf32>
    %61 = arith.mulf %53, %19 : vector<128x1xf32>
    %cst_10 = arith.constant 5.000000e+00 : f32
    %62 = vector.broadcast %cst_10 : f32 to vector<1x128xf32>
    %63 = arith.cmpf oeq, %5, %62 : vector<1x128xf32>
    %64 = vector.shape_cast %63 : vector<1x128xi1> to vector<1x128xi1>
    %65 = vector.broadcast %64 : vector<1x128xi1> to vector<128x128xi1>
    %66 = vector.shape_cast %61 : vector<128x1xf32> to vector<128x1xf32>
    %67 = vector.broadcast %66 : vector<128x1xf32> to vector<128x128xf32>
    %68 = arith.select %65, %67, %60 : vector<128x128xi1>, vector<128x128xf32>
    %69 = arith.mulf %14, %68 : vector<128x128xf32>
    %c0_11 = arith.constant 0 : index
    %c0_12 = arith.constant 0 : index
    %70 = vector.load %arg3[%c0_11, %c0_12] : memref<128x128xf32, #tpu.memory_space<vmem>>, vector<128x128xf32>
    %cst_13 = arith.constant dense<0.000000e+00> : vector<128x128xf32>
    %71 = tpu.matmul %69, %70, %cst_13 {dimension_numbers = #tpu.dot_dimension_numbers<[1], [0], [0], [1], [0, 0, 1, 1], [], []>} : vector<128x128xf32>, vector<128x128xf32>, vector<128x128xf32> -> vector<128x128xf32>
    %c0_14 = arith.constant 0 : index
    %c0_15 = arith.constant 0 : index
    %72 = vector.load %arg4[%c0_14, %c0_15] : memref<128x128xf32, #tpu.memory_space<vmem>>, vector<128x128xf32>
    tpu.vector_store %arg4[%c0_14, %c0_15], %71 {strides = array<i32>} : memref<128x128xf32, #tpu.memory_space<vmem>>, vector<128x128xf32>,
    return
  }
  func.func @transform_0(%arg0: i32) -> (i32, i32) {
    %c0_i32 = arith.constant 0 : i32
    %c0_i32_0 = arith.constant 0 : i32
    return %arg0, %c0_i32 : i32, i32
  }
  func.func @transform_1(%arg0: i32) -> (i32, i32) {
    %c0_i32 = arith.constant 0 : i32
    %c0_i32_0 = arith.constant 0 : i32
    %c0_i32_1 = arith.constant 0 : i32
    return %c0_i32, %c0_i32_0 : i32, i32
  }
  func.func @transform_2(%arg0: i32) -> (i32, i32) {
    %c0_i32 = arith.constant 0 : i32
    %c0_i32_0 = arith.constant 0 : i32
    %c0_i32_1 = arith.constant 0 : i32
    return %c0_i32, %c0_i32_0 : i32, i32
  }
  func.func @transform_3(%arg0: i32) -> (i32, i32) {
    %c0_i32 = arith.constant 0 : i32
    %c0_i32_0 = arith.constant 0 : i32
    return %arg0, %c0_i32 : i32, i32
  }
}

</mosaic_0001>

<bundles_post_ra>
// kernel: tpu_custom_call.1
= control target key start
LH: loop header
LB: loop body
LE: loop exit
PB: predicated region body
PF: predicated region fallthrough
CT: control target
= control target key end

     0   :  { %8 = vsyncpa [#allocation3], 0  ;;  %s2529_s0 = inlined_call_operand.vmem [shape: f32[256,1], index: 0, kind: input, shape index: {}]   ;;  %s2530_s1 = inlined_call_operand.vmem [shape: f32[8,128], index: 1, kind: input, shape index: {}]   ;;  %s2531_s2 = inlined_call_operand.vmem [shape: f32[128,128], index: 2, kind: input, shape index: {}]   ;;  %s2532_s3 = inlined_call_operand.hbm [shape: f32[256,128], index: 3, kind: output, shape index: {}]  }
   0x1   :  { %10 = vsyncpa [#allocation3 + $0x1], 0  ;;  %s1580_s12 = smov 0   ;;  %s1582_s13 = smov 0  }
   0x2   :  { %s1584_s14 = smov 0   ;;  %s1586_s15 = smov 0  }
   0x3 LB: > { %s1601_s16 = sadd.s32 4294967295, %s1553_s15   ;;  %s1281_s17 = sadd.s32 4294967294, %s1553_s15   ;;  %s1553_s15 = sphi %s1586_s15, %s2556_s15   ;;  %s1549_s14 = sphi %s1584_s14, %s2555_s14   ;;  %s1545_s13 = sphi %s1582_s13, %s2554_s13   ;;  %s1541_s12 = sphi %s1580_s12, %s2553_s12  }
   0x4   : > { %s1605_s18 = sadd.s32 1, %s1553_s15   ;;  %s91_s19 = sadd.s32 1, %s1549_s14 }
   0x5   : > { %s88_s20 = ssub.s32 %s1553_s15, %s1605_s18  ;;  %p101_p0 = scmp.ne.s32.totalorder %s1549_s14, %s1545_s13 }
   0x6   : > { %p89_p1 = scmp.eq.s32.totalorder %s88_s20, 0  ;;  %p102_p2 = scmp.eq.s32.totalorder %s1601_s16, 1 }
   0x7   : > { %p107_p3 = scmp.ne.s32.totalorder %s1545_s13, %s1541_s12  ;;  %p108_p4 = scmp.eq.s32.totalorder %s1281_s17, 1 }
   0x8   : > { %s1616_s21 = scalar_select %p89_p1, %s1549_s14, %s91_s19  }
   0x9   : > { %p1618_p5 = por %p102_p2, %p101_p0  ;;  %p1622_p6 = por %p108_p4, %p107_p3 }
   0xa   : > { %p1284_p7 = scmp.ge.s32.totalorder %s1553_s15, 1  ;;  %p141_p8 = scmp.lt.s32.totalorder %s1553_s15, 3 }
   0xc   : > { %p142_p9 = pnand %p1284_p7, %p141_p8 }
   0xd   : > { %v269_v0 = vlaneseq (!%p142_p9)  ;;  %v1631_v1 = vld [vmem:[%s2530_s1] sm:$0xff] (!%p142_p9)  ;;  %s1286_s26 = sshll.u32 (!%p142_p9), %s1601_s16, 4  ;;  %v1555_v2 = vmov (!%p142_p9), 0   ;;  %v1556_v41 = vmov (!%p142_p9), 0.0   ;;  %s1557_s9 = smov (!%p142_p9), [#allocation2]  }
   0xe   : > { %145 = sbr.rel (%p142_p9) target bundleno = 829 (0x33d), region = 32  ;;  %1490 = vset.pattern.permute.xlu1 (!%p142_p9), %v1555_v2  ;;  %vm425_vm0 = vcmp.eq.f32.partialorder (!%p142_p9), %v1631_v1, 0.0  ;;  %vm433_vm1 = vcmp.eq.f32.partialorder (!%p142_p9), %v1631_v1, 1.0  ;;  %vm552_vm2 = vcmp.eq.f32.partialorder (!%p142_p9), %v1631_v1, 2.0  ;;  %vm671_vm3 = vcmp.eq.f32.partialorder (!%p142_p9), %v1631_v1, 3.0  ;;  %1489 = vset.pattern.permute.xlu0 (!%p142_p9), %v1555_v2  ;;  %p166_p10 = scmp.lt.s32.totalorder (!%p142_p9), %s1286_s26, 31 }
   0xf   : > { %v270_v3 = vshrl.u32 (!%p142_p9), %v269_v0, 7  ;;  %v1638_v4 = vsel (!%p142_p9), %vm425_vm0, 1, %v1555_v2  ;;  %v1640_v5 = vsel (!%p142_p9), %vm433_vm1, 1, %v1555_v2  ;;  %v1642_v6 = vsel (!%p142_p9), %vm552_vm2, 1, %v1555_v2  ;;  %s1495_s10 = sshll.u32 (!%p142_p9), %s1557_s9, 4  ;;  %s1496_s10 = int_to_ptr.vmem [resolvable:$false] %s1495_s10 }
  0x10   : > { %v1644_v7 = vsel (!%p142_p9), %vm671_vm3, 1, %v1555_v2  ;;  %vm790_vm4 = vcmp.eq.f32.partialorder (!%p142_p9), %v1631_v1, 4.0  ;;  %vm909_vm5 = vcmp.eq.f32.partialorder (!%p142_p9), %v1631_v1, 5.0  ;;  %s1497_s11 = scalar_lea.vmem (!%p142_p9), %s1496_s10, 4096 }
  0x11   : > { %v1648_v8 = vsub.s32 (!%p142_p9), 3, %v270_v3  ;;  %v1650_v9 = vsel (!%p142_p9), %vm790_vm4, 1, %v1555_v2  ;;  %v1652_v10 = vsel (!%p142_p9), %vm909_vm5, 1, %v1555_v2  ;;  %v271_v33 = vsub.s32 (!%p142_p9), 0, %v270_v3 }
  0x12   : > { %v291_v34 = vsub.s32 (!%p142_p9), 1, %v270_v3  ;;  %v359_v35 = vsub.s32 (!%p142_p9), 2, %v270_v3 }
  0x13   : > { %v430_v11 = vrot.slane (!%p142_p9), %v1638_v4, %v1648_v8  ;;  %v1736_v36 = vrot.slane (!%p142_p9), %v1631_v1, %v271_v33 }
  0x14   : > { %v1739_v37 = vrot.slane (!%p142_p9), %v1631_v1, %v291_v34  ;;  %v1742_v38 = vrot.slane (!%p142_p9), %v1631_v1, %v359_v35 }
  0x15   : > { %s2558_s26 = smov (!%p166_p10, %s1286_s26), 31 }
  0x16   : > { %s1287_s27 = sshll.u32 %s2558_s26, 3 }
  0x17   : > { %s1659_s30 = scalar_lea.vmem %s2529_s0, %s1287_s27  ;;  %s162_s27 = sand.u32 1, %s1545_s13  }
  0x18   : > { %v1670_v16 = vld [vmem:[%s1659_s30 + $0x8] sm:$0xff]  ;;  %v1673_v17 = vld [vmem:[%s1659_s30] sm:$0xff]  ;;  %v1688_v21 = vld [vmem:[%s1659_s30 + $0x50] sm:$0xff]  ;;  %s1285_s28 = sshll.u32 %s162_s27, 7 }
  0x19   : > { %196 = vperm.xlu1 %1490, %v1670_v16   ;;  %191 = vperm.xlu0 %1489, %v1673_v17   ;;  %v1680_v19 = vld [vmem:[%s1659_s30 + $0x48] sm:$0xff]  ;;  %v1683_v20 = vld [vmem:[%s1659_s30 + $0x40] sm:$0xff]  ;;  %v1691_v22 = vld [vmem:[%s1659_s30 + $0x10] sm:$0xff]  ;;  %s2459_s29 = scalar_lea.vmem [#allocation2], %s1285_s28 }
  0x1a   : > { %v1696_v23 = vld [vmem:[%s1659_s30 + $0x58] sm:$0xff]  ;;  %v1704_v25 = vld [vmem:[%s1659_s30 + $0x60] sm:$0xff]  ;;  %v1712_v27 = vld [vmem:[%s1659_s30 + $0x68] sm:$0xff]  ;;  %s1219_s4 = sshll.u32 %s2459_s29, 4  ;;  %s2482_s4 = int_to_ptr.vmem [resolvable:$true] %s1219_s4 }
  0x1b   : > { %v1699_v24 = vld [vmem:[%s1659_s30 + $0x18] sm:$0xff]  ;;  %v1707_v26 = vld [vmem:[%s1659_s30 + $0x20] sm:$0xff]  ;;  %v1715_v28 = vld [vmem:[%s1659_s30 + $0x28] sm:$0xff]  ;;  %s1491_s8 = scalar_lea.vmem %s2482_s4, 2048  ;;  %p1498_p0 = scmp.lt.s32.totalorder %s2482_s4, %s1496_s10 }
  0x1c   : > { %v1720_v29 = vld [vmem:[%s1659_s30 + $0x70] sm:$0xff]  ;;  %v1728_v31 = vld [vmem:[%s1659_s30 + $0x78] sm:$0xff]  ;;  %p1492_p11 = scmp.ne.s32.totalorder %s2482_s4, %s1491_s8  ;;  %p1499_p1 = scmp.lt.s32.totalorder %s1497_s11, %s1491_s8 }
  0x1d   : > { %236 = vperm.xlu1 %1490, %v1680_v19   ;;  %231 = vperm.xlu0 %1489, %v1683_v20   ;;  %v1723_v30 = vld [vmem:[%s1659_s30 + $0x30] sm:$0xff]  ;;  %v1731_v32 = vld [vmem:[%s1659_s30 + $0x38] sm:$0xff]  ;;  %s1309_s30 = sshll.u32 %s1601_s16, 11  ;;  %s2488_s16 = scalar_lea.sflag [#allocation3], %s162_s27 }
  0x1e   : > { %s2480_s7 = scalar_lea.hbm %s2532_s3, %s1309_s30  ;;  %p1493_p12 = pnand %p1492_p11, %p1618_p5 }
  0x1f   : > { %p1500_p2 = por %p1499_p1, %p1498_p0 }
  0x20   : > { %p1494_p13 = pneg %p1493_p12 }
  0x21   : > { %241 = vperm.xlu1 %1490, %v1688_v21   ;;  %201 = vperm.xlu0 %1489, %v1691_v22  }
  0x22   : > { %p1501_p3 = pnand %p1500_p2, %p1494_p13 }
  0x25   : > { %246 = vperm.xlu1 %1490, %v1696_v23   ;;  %206 = vperm.xlu0 %1489, %v1699_v24  }
  0x29   : > { %251 = vperm.xlu1 %1490, %v1704_v25   ;;  %211 = vperm.xlu0 %1489, %v1707_v26  }
  0x2d   : > { %256 = vperm.xlu1 %1490, %v1712_v27   ;;  %216 = vperm.xlu0 %1489, %v1715_v28  }
  0x31   : > { %261 = vperm.xlu1 %1490, %v1720_v29   ;;  %221 = vperm.xlu0 %1489, %v1723_v30  }
  0x35   : > { %266 = vperm.xlu1 %1490, %v1728_v31   ;;  %226 = vperm.xlu0 %1489, %v1731_v32  }
  0x98   : > { %v197_v39 = vpop.permute.xlu1 %196  ;;  %v192_v40 = vpop.permute.xlu0 %191 }
  0x99   : > { %vm274_vm6 = vcmp.ge.f32.partialorder %v197_v39, %v1736_v36  ;;  %vm294_vm7 = vcmp.lt.f32.partialorder %v197_v39, %v1739_v37  ;;  %vm273_vm8 = vcmp.ge.f32.partialorder %v192_v40, %v1736_v36  ;;  %vm293_vm9 = vcmp.lt.f32.partialorder %v192_v40, %v1739_v37 }
  0x9a   : > { %vm309_vm10 = vmand %vm273_vm8, %vm293_vm9 }
  0x9b   : > { %v1749_v42 = vsel %vm309_vm10, 1.0, %v1556_v41  ;;  %vm310_vm11 = vmand %vm274_vm6, %vm294_vm7 }
  0x9c   : > { %v237_v43 = vpop.permute.xlu1 %236  ;;  %v232_v44 = vpop.permute.xlu0 %231  ;;  %v361_v45 = vmul.f32 %v1749_v42, %v1742_v38  ;;  %v1754_v46 = vsel %vm310_vm11, 1.0, %v1556_v41 }
  0x9d   : > { %vm282_vm12 = vcmp.ge.f32.partialorder %v237_v43, %v1736_v36  ;;  %vm302_vm13 = vcmp.lt.f32.partialorder %v237_v43, %v1739_v37  ;;  %vm281_vm14 = vcmp.ge.f32.partialorder %v232_v44, %v1736_v36  ;;  %vm301_vm15 = vcmp.lt.f32.partialorder %v232_v44, %v1739_v37 }
  0x9e   : > { %377 = vadd.xlane.f32.xlu0 %v361_v45  ;;  %v362_v47 = vmul.f32 %v1754_v46, %v1742_v38  ;;  %vm317_vm0 = vmand %vm281_vm14, %vm301_vm15 }
  0x9f   : > { %v1763_v48 = vsel %vm317_vm0, 1.0, %v1556_v41  ;;  %vm318_vm1 = vmand %vm282_vm12, %vm302_vm13 }
  0xa0   : > { %v242_v49 = vpop.permute.xlu1 %241  ;;  %v202_v50 = vpop.permute.xlu0 %201  ;;  %v369_v51 = vmul.f32 %v1763_v48, %v1742_v38  ;;  %v1768_v52 = vsel %vm318_vm1, 1.0, %v1556_v41 }
  0xa1   : > { %vm283_vm2 = vcmp.ge.f32.partialorder %v242_v49, %v1736_v36  ;;  %vm303_vm3 = vcmp.lt.f32.partialorder %v242_v49, %v1739_v37  ;;  %vm275_vm4 = vcmp.ge.f32.partialorder %v202_v50, %v1736_v36  ;;  %vm295_vm5 = vcmp.lt.f32.partialorder %v202_v50, %v1739_v37 }
  0xa2   : > { %379 = vadd.xlane.f32.xlu0 %v362_v47  ;;  %393 = vadd.xlane.f32.xlu1 %v369_v51  ;;  %v370_v53 = vmul.f32 %v1768_v52, %v1742_v38  ;;  %vm311_vm6 = vmand %vm275_vm4, %vm295_vm5 }
  0xa3   : > { %v1777_v54 = vsel %vm311_vm6, 1.0, %v1556_v41  ;;  %vm319_vm7 = vmand %vm283_vm2, %vm303_vm3 }
  0xa4   : > { %v247_v55 = vpop.permute.xlu1 %246  ;;  %v207_v56 = vpop.permute.xlu0 %206  ;;  %v363_v57 = vmul.f32 %v1777_v54, %v1742_v38  ;;  %v1782_v58 = vsel %vm319_vm7, 1.0, %v1556_v41 }
  0xa5   : > { %vm284_vm8 = vcmp.ge.f32.partialorder %v247_v55, %v1736_v36  ;;  %vm304_vm9 = vcmp.lt.f32.partialorder %v247_v55, %v1739_v37  ;;  %vm276_vm10 = vcmp.ge.f32.partialorder %v207_v56, %v1736_v36  ;;  %vm296_vm11 = vcmp.lt.f32.partialorder %v207_v56, %v1739_v37 }
  0xa6   : > { %395 = vadd.xlane.f32.xlu0 %v370_v53  ;;  %381 = vadd.xlane.f32.xlu1 %v363_v57  ;;  %v371_v59 = vmul.f32 %v1782_v58, %v1742_v38  ;;  %vm312_vm12 = vmand %vm276_vm10, %vm296_vm11 }
  0xa7   : > { %v1791_v60 = vsel %vm312_vm12, 1.0, %v1556_v41  ;;  %vm320_vm13 = vmand %vm284_vm8, %vm304_vm9 }
  0xa8   : > { %v252_v61 = vpop.permute.xlu1 %251  ;;  %v212_v62 = vpop.permute.xlu0 %211  ;;  %v364_v63 = vmul.f32 %v1791_v60, %v1742_v38  ;;  %v1796_v0 = vsel %vm320_vm13, 1.0, %v1556_v41 }
  0xa9   : > { %vm285_vm14 = vcmp.ge.f32.partialorder %v252_v61, %v1736_v36  ;;  %vm305_vm15 = vcmp.lt.f32.partialorder %v252_v61, %v1739_v37  ;;  %vm277_vm0 = vcmp.ge.f32.partialorder %v212_v62, %v1736_v36  ;;  %vm297_vm1 = vcmp.lt.f32.partialorder %v212_v62, %v1739_v37 }
  0xaa   : > { %397 = vadd.xlane.f32.xlu0 %v371_v59  ;;  %383 = vadd.xlane.f32.xlu1 %v364_v63  ;;  %vm313_vm2 = vmand %vm277_vm0, %vm297_vm1  ;;  %v372_v33 = vmul.f32 %v1796_v0, %v1742_v38 }
  0xab   : > { %v1803_v1 = vsel %vm313_vm2, 1.0, %v1556_v41  ;;  %vm321_vm3 = vmand %vm285_vm14, %vm305_vm15 }
  0xac   : > { %v257_v2 = vpop.permute.xlu1 %256  ;;  %v217_v3 = vpop.permute.xlu0 %216  ;;  %v365_v34 = vmul.f32 %v1803_v1, %v1742_v38  ;;  %v1810_v35 = vsel %vm321_vm3, 1.0, %v1556_v41 }
  0xad   : > { %vm286_vm4 = vcmp.ge.f32.partialorder %v257_v2, %v1736_v36  ;;  %vm306_vm5 = vcmp.lt.f32.partialorder %v257_v2, %v1739_v37  ;;  %vm278_vm6 = vcmp.ge.f32.partialorder %v217_v3, %v1736_v36  ;;  %vm298_vm7 = vcmp.lt.f32.partialorder %v217_v3, %v1739_v37 }
  0xae   : > { %399 = vadd.xlane.f32.xlu0 %v372_v33  ;;  %385 = vadd.xlane.f32.xlu1 %v365_v34  ;;  %vm314_vm8 = vmand %vm278_vm6, %vm298_vm7  ;;  %v373_v44 = vmul.f32 %v1810_v35, %v1742_v38  ;;  %vm431_vm6 = vcmp.eq.s32.totalorder %v430_v11, 1 }
  0xaf   : > { %v1817_v39 = vsel %vm314_vm8, 1.0, %v1556_v41  ;;  %vm322_vm9 = vmand %vm286_vm4, %vm306_vm5  ;;  %v2049_v11 = vsel %vm431_vm6, 1.0, %v1556_v41 }
  0xb0   : > { %v262_v40 = vpop.permute.xlu1 %261  ;;  %v222_v43 = vpop.permute.xlu0 %221  ;;  %v366_v45 = vmul.f32 %v1817_v39, %v1742_v38  ;;  %v1824_v47 = vsel %vm322_vm9, 1.0, %v1556_v41 }
  0xb1   : > { %vm287_vm10 = vcmp.ge.f32.partialorder %v262_v40, %v1736_v36  ;;  %vm307_vm11 = vcmp.lt.f32.partialorder %v262_v40, %v1739_v37  ;;  %vm279_vm12 = vcmp.ge.f32.partialorder %v222_v43, %v1736_v36  ;;  %vm299_vm13 = vcmp.lt.f32.partialorder %v222_v43, %v1739_v37 }
  0xb2   : > { %401 = vadd.xlane.f32.xlu0 %v373_v44  ;;  %387 = vadd.xlane.f32.xlu1 %v366_v45  ;;  %vm315_vm14 = vmand %vm279_vm12, %vm299_vm13  ;;  %v374_v53 = vmul.f32 %v1824_v47, %v1742_v38 }
  0xb3   : > { %v1831_v49 = vsel %vm315_vm14, 1.0, %v1556_v41  ;;  %vm323_vm15 = vmand %vm287_vm10, %vm307_vm11 }
  0xb4   : > { %v267_v50 = vpop.permute.xlu1 %266  ;;  %v227_v51 = vpop.permute.xlu0 %226  ;;  %v367_v55 = vmul.f32 %v1831_v49, %v1742_v38  ;;  %v1838_v56 = vsel %vm323_vm15, 1.0, %v1556_v41 }
  0xb5   : > { %vm288_vm0 = vcmp.ge.f32.partialorder %v267_v50, %v1736_v36  ;;  %vm308_vm1 = vcmp.lt.f32.partialorder %v267_v50, %v1739_v37  ;;  %vm280_vm2 = vcmp.ge.f32.partialorder %v227_v51, %v1736_v36  ;;  %vm300_vm3 = vcmp.lt.f32.partialorder %v227_v51, %v1739_v37 }
  0xb6   : > { %vm324_vm4 = vmand %vm288_vm0, %vm308_vm1  ;;  %403 = vadd.xlane.f32.xlu0 %v374_v53  ;;  %389 = vadd.xlane.f32.xlu1 %v367_v55  ;;  %v375_v57 = vmul.f32 %v1838_v56, %v1742_v38 }
  0xb7   : > { %vm316_vm5 = vmand %vm280_vm2, %vm300_vm3  ;;  %v1852_v62 = vsel %vm324_vm4, 1.0, %v1556_v41 }
  0xb8   : > { %v1847_v59 = vsel %vm316_vm5, 1.0, %v1556_v41  ;;  %v376_v36 = vmul.f32 %v1852_v62, %v1742_v38  ;;  %v1037_v41 = vld [vmem:[%s2531_s2 + $0x48] sm:$0xff] }
  0xb9   : > { %v368_v61 = vmul.f32 %v1847_v59, %v1742_v38 }
  0xba   : > { %405 = vadd.xlane.f32.xlu0 %v375_v57 }
  0xbb   : > { %391 = vadd.xlane.f32.xlu1 %v368_v61 }
  0xbe   : > { %407 = vadd.xlane.f32.xlu0 %v376_v36 }
 0x12b   : > { %v378_v37 = vpop.xlane.xlu0 %377 }
 0x12c   : > { %v1857_v63 = vsub.f32 %v1673_v17, %v378_v37 }
 0x12e   : > { %442 = vperm.xlu1 %1490, %v1857_v63  }
 0x12f   : > { %v394_v2 = vpop.xlane.xlu1 %393  ;;  %v380_v3 = vpop.xlane.xlu0 %379 }
 0x130   : > { %v1861_v33 = vsub.f32 %v1670_v16, %v380_v3 }
 0x132   : > { %447 = vperm.xlu0 %1489, %v1861_v33  }
 0x133   : > { %v382_v34 = vpop.xlane.xlu1 %381  ;;  %v396_v40 = vpop.xlane.xlu0 %395 }
 0x134   : > { %v1865_v43 = vsub.f32 %v1691_v22, %v382_v34  ;;  %v1877_v22 = vsub.f32 %v1683_v20, %v394_v2 }
 0x136   : > { %452 = vperm.xlu1 %1490, %v1865_v43   ;;  %v538_v3 = vmul.f32 %v1865_v43, %v1865_v43 }
 0x137   : > { %v384_v38 = vpop.xlane.xlu1 %383  ;;  %v398_v44 = vpop.xlane.xlu0 %397 }
 0x138   : > { %v1869_v17 = vsub.f32 %v1699_v24, %v384_v38  ;;  %v1885_v24 = vsub.f32 %v1680_v19, %v396_v40  ;;  %v657_v15 = vmul.f32 %v538_v3, %v1865_v43 }
 0x13a   : > { %457 = vperm.xlu1 %1490, %v1869_v17   ;;  %v539_v34 = vmul.f32 %v1869_v17, %v1869_v17 }
 0x13b   : > { %v386_v45 = vpop.xlane.xlu1 %385  ;;  %v400_v50 = vpop.xlane.xlu0 %399 }
 0x13c   : > { %v1873_v16 = vsub.f32 %v1707_v26, %v386_v45  ;;  %v1888_v26 = vsub.f32 %v1688_v21, %v398_v44  ;;  %v1893_v61 = vsub.f32 %v1696_v23, %v400_v50  ;;  %v658_v13 = vmul.f32 %v539_v34, %v1869_v17 }
 0x13e   : > { %462 = vperm.xlu0 %1489, %v1873_v16   ;;  %v546_v40 = vmul.f32 %v1888_v26, %v1888_v26  ;;  %v540_v38 = vmul.f32 %v1873_v16, %v1873_v16  ;;  %v547_v44 = vmul.f32 %v1893_v61, %v1893_v61 }
 0x13f   : > { %v388_v51 = vpop.xlane.xlu1 %387  ;;  %v402_v53 = vpop.xlane.xlu0 %401 }
 0x140   : > { %v1880_v55 = vsub.f32 %v1715_v28, %v388_v51  ;;  %v1896_v28 = vsub.f32 %v1704_v25, %v402_v53  ;;  %v659_v12 = vmul.f32 %v540_v38, %v1873_v16 }
 0x142   : > { %467 = vperm.xlu1 %1490, %v1880_v55   ;;  %482 = vperm.xlu0 %1489, %v1877_v22   ;;  %v541_v45 = vmul.f32 %v1880_v55, %v1880_v55  ;;  %v548_v50 = vmul.f32 %v1896_v28, %v1896_v28 }
 0x143   : > { %v404_v57 = vpop.xlane.xlu0 %403  ;;  %v390_v20 = vpop.xlane.xlu1 %389 }
 0x144   : > { %v1901_v21 = vsub.f32 %v1723_v30, %v390_v20  ;;  %v1904_v36 = vsub.f32 %v1712_v27, %v404_v57  ;;  %v536_v27 = vmul.f32 %v1857_v63, %v1857_v63 }
 0x146   : > { %487 = vperm.xlu1 %1490, %v1885_v24   ;;  %492 = vperm.xlu0 %1489, %v1888_v26   ;;  %v542_v51 = vmul.f32 %v1901_v21, %v1901_v21  ;;  %v549_v53 = vmul.f32 %v1904_v36, %v1904_v36 }
 0x147   : > { %v406_v19 = vpop.xlane.xlu0 %405 }
 0x148   : > { %v392_v37 = vpop.xlane.xlu1 %391  ;;  %v1912_v25 = vsub.f32 %v1720_v29, %v406_v19  ;;  %v544_v29 = vmul.f32 %v1877_v22, %v1877_v22  ;;  %v655_v19 = vmul.f32 %v536_v27, %v1857_v63 }
 0x149   : > { %v1909_v23 = vsub.f32 %v1731_v32, %v392_v37  ;;  %v537_v32 = vmul.f32 %v1861_v33, %v1861_v33 }
 0x14a   : > { %497 = vperm.xlu1 %1490, %v1893_v61   ;;  %502 = vperm.xlu0 %1489, %v1896_v28   ;;  %v550_v20 = vmul.f32 %v1912_v25, %v1912_v25  ;;  %v663_v18 = vmul.f32 %v544_v29, %v1877_v22 }
 0x14b   : > { %v408_v2 = vpop.xlane.xlu0 %407  ;;  %v543_v57 = vmul.f32 %v1909_v23, %v1909_v23 }
 0x14c   : > { %v1917_v30 = vsub.f32 %v1728_v31, %v408_v2  ;;  %v545_v31 = vmul.f32 %v1885_v24, %v1885_v24  ;;  %v656_v2 = vmul.f32 %v537_v32, %v1861_v33 }
 0x14e   : > { %472 = vperm.xlu0 %1489, %v1901_v21   ;;  %507 = vperm.xlu1 %1490, %v1904_v36   ;;  %v551_v37 = vmul.f32 %v1917_v30, %v1917_v30  ;;  %v664_v14 = vmul.f32 %v545_v31, %v1885_v24 }
 0x152   : > { %477 = vperm.xlu0 %1489, %v1909_v23   ;;  %512 = vperm.xlu1 %1490, %v1912_v25  }
 0x156   : > { %561 = vperm.xlu0 %1489, %v536_v27   ;;  %517 = vperm.xlu1 %1490, %v1917_v30   ;;  %v665_v27 = vmul.f32 %v546_v40, %v1888_v26 }
 0x15a   : > { %566 = vperm.xlu0 %1489, %v537_v32   ;;  %601 = vperm.xlu1 %1490, %v544_v29   ;;  %v666_v32 = vmul.f32 %v547_v44, %v1893_v61  ;;  %v660_v29 = vmul.f32 %v541_v45, %v1880_v55 }
 0x15e   : > { %571 = vperm.xlu0 %1489, %v538_v3   ;;  %606 = vperm.xlu1 %1490, %v545_v31   ;;  %v667_v3 = vmul.f32 %v548_v50, %v1896_v28  ;;  %v661_v31 = vmul.f32 %v542_v51, %v1901_v21 }
 0x162   : > { %576 = vperm.xlu0 %1489, %v539_v34   ;;  %611 = vperm.xlu1 %1490, %v546_v40   ;;  %v668_v34 = vmul.f32 %v549_v53, %v1904_v36  ;;  %v1966_v40 = vmul.f32 %v543_v57, %v1909_v23 }
 0x166   : > { %581 = vperm.xlu0 %1489, %v540_v38   ;;  %616 = vperm.xlu1 %1490, %v547_v44   ;;  %v1969_v38 = vmul.f32 %v550_v20, %v1912_v25  ;;  %v1974_v44 = vmul.f32 %v655_v19, %v1857_v63 }
 0x16a   : > { %586 = vperm.xlu0 %1489, %v541_v45   ;;  %621 = vperm.xlu1 %1490, %v548_v50   ;;  %v1977_v45 = vmul.f32 %v551_v37, %v1917_v30  ;;  %v1982_v50 = vmul.f32 %v664_v14, %v1885_v24 }
 0x16e   : > { %591 = vperm.xlu0 %1489, %v542_v51   ;;  %626 = vperm.xlu1 %1490, %v549_v53   ;;  %v1985_v51 = vmul.f32 %v663_v18, %v1877_v22  ;;  %v1990_v53 = vmul.f32 %v657_v15, %v1865_v43 }
 0x172   : > { %596 = vperm.xlu0 %1489, %v543_v57   ;;  %631 = vperm.xlu1 %1490, %v550_v20   ;;  %v1993_v57 = vmul.f32 %v656_v2, %v1861_v33  ;;  %v1028_v20 = vld [vmem:[%s2531_s2] sm:$0xff] }
 0x176   : > { %680 = vperm.xlu0 %1489, %v655_v19   ;;  %636 = vperm.xlu1 %1490, %v551_v37   ;;  %v2004_v19 = vmul.f32 %v666_v32, %v1893_v61  ;;  %v1030_v37 = vld [vmem:[%s2531_s2 + $0x10] sm:$0xff] }
 0x17a   : > { %685 = vperm.xlu0 %1489, %v656_v2   ;;  %720 = vperm.xlu1 %1490, %v663_v18   ;;  %v1031_v2 = vld [vmem:[%s2531_s2 + $0x18] sm:$0xff] }
 0x17e   : > { %690 = vperm.xlu0 %1489, %v657_v15   ;;  %725 = vperm.xlu1 %1490, %v664_v14   ;;  %v1029_v14 = vld [vmem:[%s2531_s2 + $0x8] sm:$0xff]  ;;  %v2007_v15 = vmul.f32 %v665_v27, %v1888_v26 }
 0x17f   : > { %v1398_v18 = vpack.c.bf16 %v1029_v14, %v1028_v20  ;;  %v2021_v20 = vmul.f32 %v658_v13, %v1869_v17  ;;  %v1032_v14 = vld [vmem:[%s2531_s2 + $0x20] sm:$0xff] }
 0x181   : > { %1399 = vmatprep.subr.bf16.mxu0 %v1398_v18  ;;  %1430 = vmatprep.subr.bf16.mxu1 %v1398_v18 }
 0x182   : > { %695 = vperm.xlu0 %1489, %v658_v13   ;;  %730 = vperm.xlu1 %1490, %v665_v27   ;;  %v2018_v27 = vmul.f32 %v659_v12, %v1873_v16  ;;  %v2035_v13 = vmul.f32 %v660_v29, %v1880_v55 }
 0x183   : > { %1401 = vmatpush3.bf16.msra.mxu0 %v1398_v18  ;;  %1438 = vmatpush3.bf16.msra.mxu1 %v1398_v18  ;;  %v1033_v18 = vld [vmem:[%s2531_s2 + $0x28] sm:$0xff] }
 0x186   : > { %700 = vperm.xlu0 %1489, %v659_v12   ;;  %735 = vperm.xlu1 %1490, %v666_v32   ;;  %v1402_v32 = vpack.c.bf16 %v1031_v2, %v1030_v37  ;;  %v1406_v12 = vpack.c.bf16 %v1033_v18, %v1032_v14  ;;  %v2038_v37 = vmul.f32 %v667_v3, %v1896_v28  ;;  %v1034_v2 = vld [vmem:[%s2531_s2 + $0x30] sm:$0xff] }
 0x187   : > { %v2059_v14 = vmul.f32 %v661_v31, %v1901_v21  ;;  %v2062_v18 = vmul.f32 %v668_v34, %v1904_v36 }
 0x188   : > { %1403 = vmatprep.subr.bf16.mxu0 %v1402_v32  ;;  %1431 = vmatprep.subr.bf16.mxu1 %v1402_v32 }
 0x189   : > { %1405 = vmatpush3.bf16.msra.mxu0 %v1402_v32  ;;  %1439 = vmatpush3.bf16.msra.mxu1 %v1402_v32  ;;  %v1035_v32 = vld [vmem:[%s2531_s2 + $0x38] sm:$0xff] }
 0x18a   : > { %705 = vperm.xlu0 %1489, %v660_v29   ;;  %740 = vperm.xlu1 %1490, %v667_v3   ;;  %v1410_v4 = vpack.c.bf16 %v1035_v32, %v1034_v2  ;;  %v2535_v29 = vrot.slane %v1640_v5, %v1648_v8  ;;  %v1036_v5 = vld [vmem:[%s2531_s2 + $0x40] sm:$0xff]  ;;  %v2080_v2 = vmul.f32 %v1966_v40, %v1909_v23 }
 0x18b   : > { %1407 = vmatprep.subr.bf16.mxu0 %v1406_v12  ;;  %1432 = vmatprep.subr.bf16.mxu1 %v1406_v12  ;;  %v2084_v32 = vmul.f32 %v1969_v38, %v1912_v25 }
 0x18c   : > { %vm2054_vm7 = vcmp.eq.s32.totalorder %v2535_v29, 1  ;;  %v1038_v29 = vld [vmem:[%s2531_s2 + $0x50] sm:$0xff] }
 0x18d   : > { %1409 = vmatpush3.bf16.msra.mxu0 %v1406_v12  ;;  %1440 = vmatpush3.bf16.msra.mxu1 %v1406_v12 }
 0x18e   : > { %710 = vperm.xlu0 %1489, %v661_v31   ;;  %745 = vperm.xlu1 %1490, %v668_v34   ;;  %v1414_v34 = vpack.c.bf16 %v1037_v41, %v1036_v5  ;;  %v1039_v5 = vld [vmem:[%s2531_s2 + $0x58] sm:$0xff]  ;;  %v901_v41 = vmul.f32 %v1985_v51, %v1877_v22  ;;  %v1042_v22 = vld [vmem:[%s2531_s2 + $0x70] sm:$0xff] }
 0x18f   : > { %1411 = vmatprep.subr.bf16.mxu0 %v1410_v4  ;;  %1433 = vmatprep.subr.bf16.mxu1 %v1410_v4 }
 0x191   : > { %1413 = vmatpush3.bf16.msra.mxu0 %v1410_v4  ;;  %1441 = vmatpush3.bf16.msra.mxu1 %v1410_v4 }
 0x192   : > { %715 = vperm.xlu0 %1489, %v1966_v40   ;;  %750 = vperm.xlu1 %1490, %v1969_v38   ;;  %v1418_v38 = vpack.c.bf16 %v1039_v5, %v1038_v29  ;;  %v1040_v40 = vld [vmem:[%s2531_s2 + $0x60] sm:$0xff]  ;;  %v1041_v29 = vld [vmem:[%s2531_s2 + $0x68] sm:$0xff]  ;;  %v893_v5 = vmul.f32 %v1974_v44, %v1857_v63 }
 0x193   : > { %1415 = vmatprep.subr.bf16.mxu0 %v1414_v34  ;;  %1434 = vmatprep.subr.bf16.mxu1 %v1414_v34 }
 0x195   : > { %1417 = vmatpush3.bf16.msra.mxu0 %v1414_v34  ;;  %1442 = vmatpush3.bf16.msra.mxu1 %v1414_v34  ;;  %v2104_v34 = vmul.f32 %v1977_v45, %v1917_v30 }
 0x196   : > { %799 = vperm.xlu0 %1489, %v1974_v44   ;;  %755 = vperm.xlu1 %1490, %v1977_v45   ;;  %v1422_v45 = vpack.c.bf16 %v1041_v29, %v1040_v40  ;;  %v1043_v40 = vld [vmem:[%s2531_s2 + $0x78] sm:$0xff]  ;;  %v902_v44 = vmul.f32 %v1982_v50, %v1885_v24  ;;  %v896_v24 = vmul.f32 %v2021_v20, %v1869_v17 }
 0x197   : > { %1419 = vmatprep.subr.bf16.mxu0 %v1418_v38  ;;  %1435 = vmatprep.subr.bf16.mxu1 %v1418_v38  ;;  %v1426_v63 = vpack.c.bf16 %v1043_v40, %v1042_v22  ;;  %v895_v22 = vmul.f32 %v1990_v53, %v1865_v43  ;;  %v904_v43 = vmul.f32 %v2004_v19, %v1893_v61 }
 0x198   : > { %v897_v17 = vmul.f32 %v2018_v27, %v1873_v16  ;;  %v898_v40 = vmul.f32 %v2035_v13, %v1880_v55  ;;  %v905_v61 = vmul.f32 %v2038_v37, %v1896_v28  ;;  %v906_v55 = vmul.f32 %v2062_v18, %v1904_v36 }
 0x199   : > { %1421 = vmatpush3.bf16.msra.mxu0 %v1418_v38  ;;  %1443 = vmatpush3.bf16.msra.mxu1 %v1418_v38 }
 0x19a   : > { %844 = vperm.xlu0 %1489, %v1982_v50   ;;  %839 = vperm.xlu1 %1490, %v1985_v51   ;;  %v894_v51 = vmul.f32 %v1993_v57, %v1861_v33 }
 0x19b   : > { %1423 = vmatprep.subr.bf16.mxu0 %v1422_v45  ;;  %1436 = vmatprep.subr.bf16.mxu1 %v1422_v45 }
 0x19d   : > { %1425 = vmatpush3.bf16.msra.mxu0 %v1422_v45  ;;  %1444 = vmatpush3.bf16.msra.mxu1 %v1422_v45 }
 0x19e   : > { %809 = vperm.xlu0 %1489, %v1990_v53   ;;  %804 = vperm.xlu1 %1490, %v1993_v57   ;;  %v903_v57 = vmul.f32 %v2007_v15, %v1888_v26 }
 0x19f   : > { %1427 = vmatprep.subr.bf16.mxu0 %v1426_v63  ;;  %1437 = vmatprep.subr.bf16.mxu1 %v1426_v63 }
 0x1a1   : > { %1429 = vmatpush3.bf16.msra.mxu0 %v1426_v63  ;;  %1445 = vmatpush3.bf16.msra.mxu1 %v1426_v63 }
 0x1a2   : > { %854 = vperm.xlu0 %1489, %v2004_v19   ;;  %849 = vperm.xlu1 %1490, %v2007_v15  }
 0x1a6   : > { %819 = vperm.xlu0 %1489, %v2018_v27   ;;  %814 = vperm.xlu1 %1490, %v2021_v20  }
 0x1aa   : > { %824 = vperm.xlu0 %1489, %v2035_v13   ;;  %859 = vperm.xlu1 %1490, %v2038_v37  }
 0x1ad   : > { %v2064_v12 = vpop.permute.xlu1 %442 }
 0x1ae   : > { %829 = vperm.xlu0 %1489, %v2059_v14   ;;  %864 = vperm.xlu1 %1490, %v2062_v18  }
 0x1b1   : > { %v2086_v4 = vpop.permute.xlu0 %447 }
 0x1b2   : > { %834 = vperm.xlu0 %1489, %v2080_v2   ;;  %869 = vperm.xlu1 %1490, %v2084_v32  }
 0x1b5   : > { %v2106_v31 = vpop.permute.xlu1 %452 }
 0x1b6   : > { %958 = vperm.xlu0 %1489, %v901_v41   ;;  %874 = vperm.xlu1 %1490, %v2104_v34  }
 0x1b9   : > { %v2123_v38 = vpop.permute.xlu1 %457 }
 0x1ba   : > { %v523_v33 = vsel %vm2054_vm7, %v2123_v38, %v2049_v11  ;;  %923 = vperm.xlu0 %1489, %v894_v51   ;;  %918 = vperm.xlu1 %1490, %v893_v5  }
 0x1bd   : > { %v2139_v41 = vpop.permute.xlu0 %462 }
 0x1be   : > { %v524_v29 = vsel %vm2054_vm7, %v2139_v41, %v2049_v11  ;;  %968 = vperm.xlu0 %1489, %v903_v57   ;;  %963 = vperm.xlu1 %1490, %v902_v44   ;;  %v899_v44 = vmul.f32 %v2059_v14, %v1901_v21  ;;  %v907_v21 = vmul.f32 %v2084_v32, %v1912_v25 }
 0x1bf   : > { %v908_v25 = vmul.f32 %v2104_v34, %v1917_v30  ;;  %v2542_v34 = vsel %vm2054_vm7, %v2086_v4, %v2049_v11 }
 0x1c1   : > { %v2149_v26 = vpop.permute.xlu1 %467  ;;  %v483_v50 = vpop.permute.xlu0 %482 }
 0x1c2   : > { %v525_v15 = vsel %vm2054_vm7, %v2149_v26, %v2049_v11  ;;  %v528_v45 = vsel %vm2054_vm7, %v483_v50, %v2049_v11  ;;  %933 = vperm.xlu0 %1489, %v896_v24   ;;  %928 = vperm.xlu1 %1490, %v895_v22   ;;  %v900_v22 = vmul.f32 %v2080_v2, %v1909_v23 }
 0x1c3   : > { %v2538_v50 = vrot.slane %v1642_v6, %v1648_v8  ;;  %v2544_v26 = vrot.slane %v1644_v7, %v1648_v8 }
 0x1c5   : > { %v488_v53 = vpop.permute.xlu1 %487  ;;  %v493_v20 = vpop.permute.xlu0 %492  ;;  %vm2201_vm8 = vcmp.eq.s32.totalorder %v2538_v50, 1  ;;  %vm2303_vm9 = vcmp.eq.s32.totalorder %v2544_v26, 1 }
 0x1c6   : > { %v529_v51 = vsel %vm2054_vm7, %v488_v53, %v2049_v11  ;;  %v530_v5 = vsel %vm2054_vm7, %v493_v20, %v2049_v11  ;;  %938 = vperm.xlu0 %1489, %v897_v17   ;;  %973 = vperm.xlu1 %1490, %v904_v43   ;;  %v2541_v17 = vsel %vm2054_vm7, %v2064_v12, %v2049_v11 }
 0x1c9   : > { %v498_v19 = vpop.permute.xlu1 %497  ;;  %v503_v16 = vpop.permute.xlu0 %502 }
 0x1ca   : > { %v531_v27 = vsel %vm2054_vm7, %v498_v19, %v2049_v11  ;;  %v532_v63 = vsel %vm2054_vm7, %v503_v16, %v2049_v11  ;;  %943 = vperm.xlu0 %1489, %v898_v40   ;;  %978 = vperm.xlu1 %1490, %v905_v61  }
 0x1cd   : > { %v508_v13 = vpop.permute.xlu1 %507  ;;  %v473_v28 = vpop.permute.xlu0 %472 }
 0x1ce   : > { %v533_v37 = vsel %vm2054_vm7, %v508_v13, %v2049_v11  ;;  %v526_v57 = vsel %vm2054_vm7, %v473_v28, %v2049_v11  ;;  %948 = vperm.xlu0 %1489, %v899_v44   ;;  %983 = vperm.xlu1 %1490, %v906_v55  }
 0x1d1   : > { %v513_v14 = vpop.permute.xlu1 %512  ;;  %v478_v36 = vpop.permute.xlu0 %477 }
 0x1d2   : > { %v534_v18 = vsel %vm2054_vm7, %v513_v14, %v2049_v11  ;;  %v527_v24 = vsel %vm2054_vm7, %v478_v36, %v2049_v11  ;;  %953 = vperm.xlu0 %1489, %v900_v22   ;;  %988 = vperm.xlu1 %1490, %v907_v21  }
 0x1d5   : > { %v518_v2 = vpop.permute.xlu1 %517  ;;  %v562_v32 = vpop.permute.xlu0 %561 }
 0x1d6   : > { %v535_v43 = vsel %vm2054_vm7, %v518_v2, %v2049_v11  ;;  %v2217_v6 = vsel %vm2201_vm8, %v562_v32, %v2541_v17  ;;  %993 = vperm.xlu1 %1490, %v908_v25  }
 0x1d9   : > { %v602_v53 = vpop.permute.xlu1 %601  ;;  %v567_v20 = vpop.permute.xlu0 %566 }
 0x1da   : > { %v2221_v30 = vsel %vm2201_vm8, %v602_v53, %v528_v45  ;;  %v2230_v40 = vsel %vm2201_vm8, %v567_v20, %v2542_v34  ;;  %v2543_v45 = vsel %vm2054_vm7, %v2106_v31, %v2049_v11 }
 0x1dd   : > { %v607_v12 = vpop.permute.xlu1 %606  ;;  %v572_v61 = vpop.permute.xlu0 %571 }
 0x1de   : > { %v2234_v19 = vsel %vm2201_vm8, %v607_v12, %v529_v51  ;;  %v2243_v16 = vsel %vm2201_vm8, %v572_v61, %v2543_v45 }
 0x1e1   : > { %v612_v4 = vpop.permute.xlu1 %611  ;;  %v577_v44 = vpop.permute.xlu0 %576 }
 0x1e2   : > { %v2247_v55 = vsel %vm2201_vm8, %v612_v4, %v530_v5  ;;  %v2256_v51 = vsel %vm2201_vm8, %v577_v44, %v523_v33 }
 0x1e5   : > { %v617_v31 = vpop.permute.xlu1 %616  ;;  %v582_v13 = vpop.permute.xlu0 %581 }
 0x1e6   : > { %v2260_v28 = vsel %vm2201_vm8, %v617_v31, %v531_v27  ;;  %v2269_v5 = vsel %vm2201_vm8, %v582_v13, %v524_v29 }
 0x1e9   : > { %v622_v38 = vpop.permute.xlu1 %621  ;;  %v587_v22 = vpop.permute.xlu0 %586 }
 0x1ea   : > { %v2273_v33 = vsel %vm2201_vm8, %v622_v38, %v532_v63  ;;  %v2282_v27 = vsel %vm2201_vm8, %v587_v22, %v525_v15  ;;  %v2547_v22 = vrot.slane %v1650_v9, %v1648_v8 }
 0x1ec   : > { %vm2359_vm10 = vcmp.eq.s32.totalorder %v2547_v22, 1 }
 0x1ed   : > { %v627_v41 = vpop.permute.xlu1 %626  ;;  %v592_v21 = vpop.permute.xlu0 %591 }
 0x1ee   : > { %v2286_v29 = vsel %vm2201_vm8, %v627_v41, %v533_v37  ;;  %v2290_v14 = vsel %vm2201_vm8, %v592_v21, %v526_v57 }
 0x1f1   : > { %v632_v63 = vpop.permute.xlu1 %631  ;;  %v597_v36 = vpop.permute.xlu0 %596 }
 0x1f2   : > { %v2294_v3 = vsel %vm2201_vm8, %v632_v63, %v534_v18  ;;  %v2298_v11 = vsel %vm2201_vm8, %v597_v36, %v527_v24 }
 0x1f5   : > { %v637_v37 = vpop.permute.xlu1 %636  ;;  %v681_v57 = vpop.permute.xlu0 %680 }
 0x1f6   : > { %v2309_v50 = vsel %vm2201_vm8, %v637_v37, %v535_v43  ;;  %v758_v18 = vsel %vm2303_vm9, %v681_v57, %v2217_v6 }
 0x1f9   : > { %v721_v25 = vpop.permute.xlu1 %720  ;;  %v686_v24 = vpop.permute.xlu0 %685 }
 0x1fa   : > { %v766_v7 = vsel %vm2303_vm9, %v721_v25, %v2221_v30  ;;  %v759_v2 = vsel %vm2303_vm9, %v686_v24, %v2230_v40 }
 0x1fd   : > { %v726_v32 = vpop.permute.xlu1 %725  ;;  %v691_v17 = vpop.permute.xlu0 %690 }
 0x1fe   : > { %v767_v23 = vsel %vm2303_vm9, %v726_v32, %v2234_v19  ;;  %v760_v43 = vsel %vm2303_vm9, %v691_v17, %v2243_v16 }
 0x201   : > { %v731_v6 = vpop.permute.xlu1 %730  ;;  %v696_v53 = vpop.permute.xlu0 %695 }
 0x202   : > { %v768_v20 = vsel %vm2303_vm9, %v731_v6, %v2247_v55  ;;  %v761_v30 = vsel %vm2303_vm9, %v696_v53, %v2256_v51 }
 0x205   : > { %v736_v34 = vpop.permute.xlu1 %735  ;;  %v701_v40 = vpop.permute.xlu0 %700 }
 0x206   : > { %v769_v12 = vsel %vm2303_vm9, %v736_v34, %v2260_v28  ;;  %v762_v61 = vsel %vm2303_vm9, %v701_v40, %v2269_v5 }
 0x209   : > { %v741_v19 = vpop.permute.xlu1 %740  ;;  %v706_v45 = vpop.permute.xlu0 %705 }
 0x20a   : > { %v770_v16 = vsel %vm2303_vm9, %v741_v19, %v2273_v33  ;;  %v763_v4 = vsel %vm2303_vm9, %v706_v45, %v2282_v27  ;;  %v2550_v19 = vrot.slane %v1652_v10, %v1648_v8 }
 0x20c   : > { %vm2399_vm11 = vcmp.eq.s32.totalorder %v2550_v19, 1 }
 0x20d   : > { %v746_v44 = vpop.permute.xlu1 %745  ;;  %v711_v55 = vpop.permute.xlu0 %710 }
 0x20e   : > { %v771_v51 = vsel %vm2303_vm9, %v746_v44, %v2286_v29  ;;  %v764_v31 = vsel %vm2303_vm9, %v711_v55, %v2290_v14 }
 0x211   : > { %v751_v13 = vpop.permute.xlu1 %750  ;;  %v716_v28 = vpop.permute.xlu0 %715 }
 0x212   : > { %v772_v5 = vsel %vm2303_vm9, %v751_v13, %v2294_v3  ;;  %v765_v38 = vsel %vm2303_vm9, %v716_v28, %v2298_v11 }
 0x215   : > { %v756_v27 = vpop.permute.xlu1 %755  ;;  %v800_v41 = vpop.permute.xlu0 %799 }
 0x216   : > { %v773_v21 = vsel %vm2303_vm9, %v756_v27, %v2309_v50  ;;  %v877_v29 = vsel %vm2359_vm10, %v800_v41, %v758_v18 }
 0x219   : > { %v840_v14 = vpop.permute.xlu1 %839  ;;  %v845_v63 = vpop.permute.xlu0 %844 }
 0x21a   : > { %v885_v36 = vsel %vm2359_vm10, %v840_v14, %v766_v7  ;;  %v886_v9 = vsel %vm2359_vm10, %v845_v63, %v767_v23 }
 0x21d   : > { %v805_v3 = vpop.permute.xlu1 %804  ;;  %v810_v11 = vpop.permute.xlu0 %809 }
 0x21e   : > { %v878_v26 = vsel %vm2359_vm10, %v805_v3, %v759_v2  ;;  %v879_v15 = vsel %vm2359_vm10, %v810_v11, %v760_v43 }
 0x221   : > { %v850_v37 = vpop.permute.xlu1 %849  ;;  %v855_v57 = vpop.permute.xlu0 %854 }
 0x222   : > { %v887_v50 = vsel %vm2359_vm10, %v850_v37, %v768_v20  ;;  %v888_v18 = vsel %vm2359_vm10, %v855_v57, %v769_v12 }
 0x225   : > { %v815_v25 = vpop.permute.xlu1 %814  ;;  %v820_v24 = vpop.permute.xlu0 %819 }
 0x226   : > { %v880_v7 = vsel %vm2359_vm10, %v815_v25, %v761_v30  ;;  %v881_v32 = vsel %vm2359_vm10, %v820_v24, %v762_v61 }
 0x229   : > { %v860_v2 = vpop.permute.xlu1 %859  ;;  %v825_v17 = vpop.permute.xlu0 %824 }
 0x22a   : > { %v889_v23 = vsel %vm2359_vm10, %v860_v2, %v770_v16  ;;  %v882_v43 = vsel %vm2359_vm10, %v825_v17, %v763_v4 }
 0x22d   : > { %v865_v6 = vpop.permute.xlu1 %864  ;;  %v830_v53 = vpop.permute.xlu0 %829 }
 0x22e   : > { %v890_v20 = vsel %vm2359_vm10, %v865_v6, %v771_v51  ;;  %v883_v34 = vsel %vm2359_vm10, %v830_v53, %v764_v31 }
 0x231   : > { %v870_v30 = vpop.permute.xlu1 %869  ;;  %v835_v40 = vpop.permute.xlu0 %834 }
 0x232   : > { %v891_v12 = vsel %vm2359_vm10, %v870_v30, %v772_v5  ;;  %v884_v61 = vsel %vm2359_vm10, %v835_v40, %v765_v38 }
 0x235   : > { %v875_v16 = vpop.permute.xlu1 %874  ;;  %v959_v4 = vpop.permute.xlu0 %958 }
 0x236   : > { %v2405_v44 = vsel %vm2359_vm10, %v875_v16, %v773_v21  ;;  %v1004_v55 = vsel %vm2399_vm11, %v959_v4, %v885_v36 }
 0x237   : > { %v1020_v51 = vmul.f32 %v1763_v48, %v1004_v55 }
 0x239   : > { %v919_v31 = vpop.permute.xlu1 %918  ;;  %1386 = vmatprep.mubr.f32.mxu1 %v1020_v51  ;;  %v924_v13 = vpop.permute.xlu0 %923 }
 0x23a   : > { %v997_v8 = vsel %vm2399_vm11, %v924_v13, %v878_v26  ;;  %v996_v10 = vsel %vm2399_vm11, %v919_v31, %v877_v29 }
 0x23b   : > { %v1013_v28 = vmul.f32 %v1754_v46, %v997_v8  ;;  %v1012_v5 = vmul.f32 %v1749_v42, %v996_v10 }
 0x23d   : > { %v964_v38 = vpop.permute.xlu1 %963  ;;  %1374 = vmatprep.mubr.f32.mxu0 %v1012_v5  ;;  %v969_v22 = vpop.permute.xlu0 %968 }
 0x23e   : > { %v1005_v33 = vsel %vm2399_vm11, %v964_v38, %v886_v9  ;;  %v1006_v48 = vsel %vm2399_vm11, %v969_v22, %v887_v50  ;;  %1375 = vmatmul.mubr.f32.vlgmr.msra.gmra.mrb[0].mxu0 %v1013_v28 }
 0x23f   : > { %v1021_v27 = vmul.f32 %v1768_v52, %v1005_v33  ;;  %v1022_v41 = vmul.f32 %v1782_v58, %v1006_v48 }
 0x241   : > { %v929_v21 = vpop.permute.xlu1 %928  ;;  %1387 = vmatmul.mubr.f32.vlgmr.msra.gmra.mrb[0].mxu1 %v1021_v27  ;;  %v934_v29 = vpop.permute.xlu0 %933 }
 0x242   : > { %v998_v42 = vsel %vm2399_vm11, %v929_v21, %v879_v15  ;;  %v999_v46 = vsel %vm2399_vm11, %v934_v29, %v880_v7  ;;  %1389 = vmatprep.mubr.f32.mxu1 %v1022_v41 }
 0x243   : > { %v1014_v14 = vmul.f32 %v1777_v54, %v998_v42  ;;  %v1015_v63 = vmul.f32 %v1791_v60, %v999_v46 }
 0x245   : > { %v974_v36 = vpop.permute.xlu1 %973  ;;  %1377 = vmatprep.mubr.f32.mxu0 %v1014_v14  ;;  %v939_v9 = vpop.permute.xlu0 %938 }
 0x246   : > { %v1007_v52 = vsel %vm2399_vm11, %v974_v36, %v888_v18  ;;  %v1000_v58 = vsel %vm2399_vm11, %v939_v9, %v881_v32  ;;  %1378 = vmatmul.mubr.f32.gmra.mrb[2].mxu0 %v1015_v63 }
 0x247   : > { %v1023_v3 = vmul.f32 %v1796_v0, %v1007_v52  ;;  %v1016_v11 = vmul.f32 %v1803_v1, %v1000_v58 }
 0x249   : > { %v979_v26 = vpop.permute.xlu1 %978  ;;  %1380 = vmatprep.mubr.f32.mxu0 %v1016_v11  ;;  %1390 = vmatmul.mubr.f32.gmra.mrb[2].mxu1 %v1023_v3  ;;  %v944_v54 = vpop.permute.xlu0 %943 }
 0x24a   : > { %v1008_v60 = vsel %vm2399_vm11, %v979_v26, %v889_v23  ;;  %v1001_v15 = vsel %vm2399_vm11, %v944_v54, %v882_v43 }
 0x24b   : > { %v1024_v37 = vmul.f32 %v1810_v35, %v1008_v60  ;;  %v1017_v57 = vmul.f32 %v1817_v39, %v1001_v15 }
 0x24d   : > { %v984_v50 = vpop.permute.xlu1 %983  ;;  %1381 = vmatmul.mubr.f32.gmra.mrb[4].mxu0 %v1017_v57  ;;  %1392 = vmatprep.mubr.f32.mxu1 %v1024_v37  ;;  %v949_v0 = vpop.permute.xlu0 %948 }
 0x24e   : > { %v1009_v1 = vsel %vm2399_vm11, %v984_v50, %v890_v20  ;;  %v1002_v18 = vsel %vm2399_vm11, %v949_v0, %v883_v34 }
 0x24f   : > { %v1025_v25 = vmul.f32 %v1824_v47, %v1009_v1  ;;  %v1018_v24 = vmul.f32 %v1831_v49, %v1002_v18 }
 0x251   : > { %v989_v7 = vpop.permute.xlu1 %988  ;;  %1383 = vmatprep.mubr.f32.mxu0 %v1018_v24  ;;  %1393 = vmatmul.mubr.f32.gmra.mrb[4].mxu1 %v1025_v25  ;;  %v954_v35 = vpop.permute.xlu0 %953 }
 0x252   : > { %v1010_v39 = vsel %vm2399_vm11, %v989_v7, %v891_v12  ;;  %v1003_v32 = vsel %vm2399_vm11, %v954_v35, %v884_v61 }
 0x253   : > { %v1026_v2 = vmul.f32 %v1838_v56, %v1010_v39  ;;  %v1019_v17 = vmul.f32 %v1847_v59, %v1003_v32 }
 0x255   : > { %v994_v23 = vpop.permute.xlu1 %993  ;;  %1384 = vmatmul.mubr.f32.gmra.mrb[6].mxu0 %v1019_v17  ;;  %1395 = vmatprep.mubr.f32.mxu1 %v1026_v2 }
 0x256   : > { %v1011_v47 = vsel %vm2399_vm11, %v994_v23, %v2405_v44 }
 0x257   : > { %v1027_v49 = vmul.f32 %v1852_v62, %v1011_v47 }
 0x259   : > { %1396 = vmatmul.mubr.f32.gmra.mrb[6].mxu1 %v1027_v49 }
 0x311   : > { %v1376_v43 = vpop.f32.mrb[0].mxu0 }
 0x312   : > { %1190 = vst [vmem:[%s2459_s29 + $0x8] sm:$0xff] %v1376_v43  ;;  %v1110_v56 = vpop.f32.mrb[1].mxu0 }
 0x313   : > { %1189 = vst [vmem:[%s2459_s29] sm:$0xff] %v1110_v56 }
 0x314   : > { %v1388_v59 = vpop.f32.mrb[0].mxu1 }
 0x315   : > { %1198 = vst [vmem:[%s2459_s29 + $0x48] sm:$0xff] %v1388_v59  ;;  %v1150_v62 = vpop.f32.mrb[1].mxu1 }
 0x316   : > { %1197 = vst [vmem:[%s2459_s29 + $0x40] sm:$0xff] %v1150_v62 }
 0x319   : > { %v1379_v6 = vpop.f32.mrb[2].mxu0 }
 0x31a   : > { %1192 = vst [vmem:[%s2459_s29 + $0x18] sm:$0xff] %v1379_v6  ;;  %v1120_v53 = vpop.f32.mrb[3].mxu0 }
 0x31b   : > { %1191 = vst [vmem:[%s2459_s29 + $0x10] sm:$0xff] %v1120_v53 }
 0x31c   : > { %v1391_v20 = vpop.f32.mrb[2].mxu1 }
 0x31d   : > { %1200 = vst [vmem:[%s2459_s29 + $0x58] sm:$0xff] %v1391_v20  ;;  %v1160_v34 = vpop.f32.mrb[3].mxu1 }
 0x31e   : > { %1199 = vst [vmem:[%s2459_s29 + $0x50] sm:$0xff] %v1160_v34 }
 0x320   : > { %v1382_v30 = vpop.f32.mrb[4].mxu0 }
 0x321   : > { %1194 = vst [vmem:[%s2459_s29 + $0x28] sm:$0xff] %v1382_v30  ;;  %v1130_v40 = vpop.f32.mrb[5].mxu0 }
 0x322   : > { %1193 = vst [vmem:[%s2459_s29 + $0x20] sm:$0xff] %v1130_v40 }
 0x324   : > { %v1394_v12 = vpop.f32.mrb[4].mxu1 }
 0x325   : > { %1202 = vst [vmem:[%s2459_s29 + $0x68] sm:$0xff] %v1394_v12  ;;  %v1170_v61 = vpop.f32.mrb[5].mxu1 }
 0x326   : > { %1201 = vst [vmem:[%s2459_s29 + $0x60] sm:$0xff] %v1170_v61 }
 0x328   : > { %v1385_v19 = vpop.f32.mrb[6].mxu0 }
 0x329   : > { %1196 = vst [vmem:[%s2459_s29 + $0x38] sm:$0xff] %v1385_v19  ;;  %v1140_v45 = vpop.f32.mrb[7].mxu0 }
 0x32a   : > { %1195 = vst [vmem:[%s2459_s29 + $0x30] sm:$0xff] %v1140_v45 }
 0x32c   : > { %v1397_v16 = vpop.f32.mrb[6].mxu1 }
 0x32d   : > { %1204 = vst [vmem:[%s2459_s29 + $0x78] sm:$0xff] %v1397_v16  ;;  %v1180_v4 = vpop.f32.mrb[7].mxu1 }
 0x32e   : > { %1203 = vst [vmem:[%s2459_s29 + $0x70] sm:$0xff] %v1180_v4 }
 0x32f   : > { %1504 = shalt.err (!%p1501_p3)
}
 0x330   : > { %s1505_s17 = scalar_lea.hbm %s2480_s7, 2048  ;;  %s1509_s24 = scalar_lea.hbm %s2532_s3, 4096 }
 0x331   : > { %p1506_p4 = scmp.ne.s32.totalorder %s2480_s7, %s1505_s17  ;;  %p1510_p9 = scmp.lt.u32.totalorder %s2480_s7, %s2532_s3 }
 0x332   : > { %p1511_p10 = scmp.lt.u32.totalorder %s1509_s24, %s1505_s17  ;;  %p1513_p12 = scmp.lt.u32.totalorder %s1505_s17, %s2480_s7 }
 0x333   : > { %p1507_p7 = pnand %p1506_p4, %p1618_p5 }
 0x334   : > { %p1512_p11 = por %p1511_p10, %p1510_p9 }
 0x335   : > { %p1508_p8 = pneg %p1507_p7 }
 0x336   : > { %p1514_p13 = por %p1513_p12, %p1512_p11 }
 0x338   : > { %p1515_p0 = pnand %p1514_p13, %p1508_p8 }
 0x33a   : > { %1518 = shalt.err (!%p1515_p0)
}
 0x33b   : > { %s1558_s27 = smov 128   ;;  %s1559_s28 = smov 8  }
 0x33c   : > { %1446 = dma.vmem_to_hbm [thread:$0]  (%p1618_p5), %s2482_s4, 2048, %s2480_s7, %s2488_s16, %s1558_s27, %s1558_s27, %s1559_s28  }
 0x33d PF: > { %p1452_p1 = scmp.ge.s32.totalorder %s1553_s15, 2  ;;  %s1234_s29 = sand.u32 1, %s1541_s12  }
 0x33e   : > { %s1235_s30 = scalar_lea.sflag [#allocation3], %s1234_s29 }
 0x33f   : > { %p1449_p2 = pnand %p1452_p1, %p1622_p6 }
 0x341   : > { %1536 = dma.done.wait (!%p1449_p2), %s1235_s30, 2048  }
 0x342   : > { %1538 = vsyncadd (!%p1449_p2), %s1235_s30, 4294965248  ;;  %p13_p3 = scmp.ge.s32.totalorder %s1605_s18, 4   ;;  %s2553_s12 = smov %s1545_s13 }
 0x343   : > { %s2554_s13 = smov %s1549_s14  ;;  %s2555_s14 = smov %s1616_s21 }
 0x344   : > { %s2556_s15 = smov %s1605_s18  ;;  %15 = sbr.rel (!%p13_p3) target bundleno = 3 (0x3), region = 67 }
 0x34b   :  { %1240 = vsyncpa [#allocation3], 1 }
 0x34c   :  { %1242 = vsyncpa [#allocation3 + $0x1], 1 }

</bundles_post_ra>
